<compile_context>
chip_gen: v6e
topology: v6e:2x2x1
jax: 0.10.0
libtpu: 0.0.40
codegen_flags: <defaults>
</compile_context>

<pallas_src>
import functools

import jax
import jax.numpy as jnp
from jax.experimental import pallas as pl
from jax.experimental.pallas import tpu as pltpu


def _round_up(v, m):
    return (v + m - 1) // m * m


def _choose_e_tile(num_ep, b, *, target_rows=256, min_steps=2):
    """Episode tile per grid step.

    Picks the largest divisor of num_ep such that (a) the flattened row count
    e_tile*b stays near `target_rows` (v6e/v7x MXU is 256-tall; v5e saturates
    at 128 -- 256 is still fine there), (b) e_tile*b is sublane-aligned, and
    (c) at least `min_steps` grid steps remain when possible so v7x's two
    TensorCores both get episode chunks.
    """
    cap = max(1, target_rows // max(b, 1))
    if num_ep >= min_steps:
        cap = min(cap, num_ep // min_steps)
    cap = max(cap, 1)
    best = None
    for d in range(1, cap + 1):
        if num_ep % d == 0 and (d * b) % 8 == 0:
            best = d
    if best is None:
        # Can't sublane-align a partial block; take everything in one step
        # (block_shape == full array dim is always legal).
        best = num_ep
    return best


def mfb_kernel(xy_ref, w_ref, g_ref, o_ref, *, joint, x_dim):
    """One grid step == E_TILE few-shot episodes, flattened along rows.

    xy_ref: (Mt, Din)        fused input [x | y | 1 | 0-pad], Mt = E_TILE*B
    w_ref : (Din, 2*joint)   block-diagonal fused weight, biases folded in
    g_ref : (Mt, E_TILE*nw)  block-diagonal one-hot group membership (f32 0/1)
    o_ref : (Mt, x_dim)
    """
    xy = xy_ref[...]                                             # storage dtype

    # --- both projections in a single MXU pass (f32 accumulation) -------------
    proj = jnp.dot(xy, w_ref[...], preferred_element_type=jnp.float32)
    # lanes [0:joint]       = Linear_dataproj(x) + bx
    # lanes [joint:2*joint] = Linear_yproj(y)    + by
    iq = proj[:, :joint] * proj[:, joint:]                       # (Mt, joint)

    # MFB_OUT_DIM == 1: .view(-1,1,1,FACTOR).sum(3).squeeze() == per-row sum.
    s = jnp.sum(iq, axis=1, keepdims=True)                       # (Mt, 1) f32

    # --- grouped softmax (each consecutive block of numKShot rows, per episode)
    g = g_ref[...]                                               # (Mt, G) 0/1
    neg = jnp.float32(-1e30)
    masked = jnp.where(g > 0.0, s, neg)                          # (Mt, G)
    m_grp = jnp.max(masked, axis=0, keepdims=True)               # (1, G)
    m_row = jnp.sum(g * m_grp, axis=1, keepdims=True)            # (Mt, 1)
    e = jnp.exp(s - m_row)                                       # (Mt, 1) (EUP)
    d_grp = jnp.sum(g * e, axis=0, keepdims=True)                # (1, G)
    d_row = jnp.sum(g * d_grp, axis=1, keepdims=True)            # (Mt, 1)
    p = e / d_row                                                # exact divide

    # --- res = attention weights * x (x sliced back out of the fused input) ---
    # NOTE: x_dim < 128 here => masked stores; keep x_dim % 128 == 0 in prod.
    o_ref[...] = (p * xy[:, :x_dim].astype(jnp.float32)).astype(o_ref.dtype)


def mfb_forward(x, y, wx, bx, wy, by, *, num_n_way, num_k_shot):
    """x: (B, x_dim) or (E, B, x_dim); y likewise with y_dim.

    wx/wy are pre-transposed nn.Linear weights (in_dim, JOINT); bx/by (JOINT,).
    In production the fused weight below would be precomputed once, not per call.
    """
    squeeze = x.ndim == 2
    if squeeze:
        x, y = x[None], y[None]
    num_ep, b, x_dim = x.shape
    y_dim = y.shape[-1]
    joint = wx.shape[1]
    assert wy.shape[1] == joint
    assert b == num_n_way * num_k_shot, "B must equal numNWay * numKShot"

    # Fused, bias-folded, zero-padded (sublane-aligned) weight: (Din, 2*joint).
    din = _round_up(x_dim + y_dim + 1, 8)
    w = jnp.zeros((din, 2 * joint), dtype=wx.dtype)
    w = w.at[:x_dim, :joint].set(wx)
    w = w.at[x_dim:x_dim + y_dim, joint:].set(wy.astype(wx.dtype))
    w = w.at[x_dim + y_dim, :joint].set(jnp.ravel(bx).astype(wx.dtype))
    w = w.at[x_dim + y_dim, joint:].set(jnp.ravel(by).astype(wx.dtype))
    # TODO(synk): at production sizes mark w with pipeline_mode=pl.Buffered(1)
    #             (loop-invariant) to halve its double-buffered VMEM footprint.

    # Fused input [x | y | 1 | 0-pad], flattened to rows: (E*B, Din).
    parts = [x, y.astype(x.dtype), jnp.ones((num_ep, b, 1), x.dtype)]
    pad = din - (x_dim + y_dim + 1)
    if pad:
        parts.append(jnp.zeros((num_ep, b, pad), x.dtype))
    xy = jnp.concatenate(parts, axis=-1).reshape(num_ep * b, din)

    # Episode tile / grid.
    e_tile = _choose_e_tile(num_ep, b)
    num_steps = num_ep // e_tile
    m_tile = e_tile * b

    # Block-diagonal one-hot group membership for one E_TILE block (hoisted out
    # of the kernel; identical for every grid step).
    base = (jnp.arange(b)[:, None] // num_k_shot
            == jnp.arange(num_n_way)[None, :]).astype(jnp.float32)  # (B, nway)
    grp = jnp.kron(jnp.eye(e_tile, dtype=jnp.float32), base)        # (Mt, G)
    grp_cols = e_tile * num_n_way

    itemsize = jnp.dtype(x.dtype).itemsize
    cost = pl.CostEstimate(
        flops=2 * num_ep * b * din * (2 * joint) + 8 * num_ep * b * joint,
        transcendentals=num_ep * b,
        bytes_accessed=int(
            xy.size * jnp.dtype(xy.dtype).itemsize      # fused input (x only once)
            + w.size * jnp.dtype(w.dtype).itemsize
            + num_steps * grp.size * 4
            + num_ep * b * x_dim * itemsize),           # output
    )

    kernel = functools.partial(mfb_kernel, joint=joint, x_dim=x_dim)
    out = pl.pallas_call(
        kernel,
        grid=(num_steps,),
        in_specs=[
            pl.BlockSpec((m_tile, din), lambda i: (i, 0)),          # fused input
            pl.BlockSpec((din, 2 * joint), lambda i: (0, 0)),       # fused weight
            pl.BlockSpec((m_tile, grp_cols), lambda i: (0, 0)),     # one-hot grps
        ],
        out_specs=pl.BlockSpec((m_tile, x_dim), lambda i: (i, 0)),
        out_shape=jax.ShapeDtypeStruct((num_ep * b, x_dim), x.dtype),
        compiler_params=pltpu.CompilerParams(
            dimension_semantics=("parallel",)),
        cost_estimate=cost,
    )(xy, w, grp)
    out = out.reshape(num_ep, b, x_dim)
    return out[0] if squeeze else out


def mfb_reference(x, y, wx, bx, wy, by, *, num_n_way, num_k_shot):
    """Pure-JAX reference of the PyTorch module (eval mode), single episode."""
    data_out = x @ wx + bx
    y_proj = y @ wy + by
    iq = data_out * y_proj
    s = jnp.sum(iq, axis=1)                           # MFB_OUT_DIM == 1
    p = jax.nn.softmax(s.reshape(num_n_way, num_k_shot), axis=1).reshape(-1, 1)
    return p * x


if __name__ == "__main__":
    # Small, module-consistent shapes.
    numNWay, numKShot = 2, 4
    B = numNWay * numKShot                            # per-episode batch
    x_dim, y_dim = 32, 32
    MFB_FACTOR_NUM, MFB_OUT_DIM = 16, 1
    JOINT = MFB_FACTOR_NUM * MFB_OUT_DIM
    E = 4                                             # episodes in one gridded call

    key = jax.random.PRNGKey(0)
    k1, k2, k3, k4, k5, k6 = jax.random.split(key, 6)

    x = jax.random.normal(k1, (E, B, x_dim), dtype=jnp.float32)
    y = jax.random.normal(k2, (E, B, y_dim), dtype=jnp.float32)

    # nn.Linear weights stored pre-transposed: (in, out); biases (out,).
    wx = jax.random.normal(k3, (x_dim, JOINT), dtype=jnp.float32) / jnp.sqrt(x_dim)
    bx = 0.1 * jax.random.normal(k4, (JOINT,), dtype=jnp.float32)
    wy = jax.random.normal(k5, (y_dim, JOINT), dtype=jnp.float32) / jnp.sqrt(y_dim)
    by = 0.1 * jax.random.normal(k6, (JOINT,), dtype=jnp.float32)

    fwd = jax.jit(functools.partial(mfb_forward,
                                    num_n_way=numNWay, num_k_shot=numKShot))
    ref = functools.partial(mfb_reference,
                            num_n_way=numNWay, num_k_shot=numKShot)

    # 1) Single episode (module-exact call signature).
    out1 = jax.block_until_ready(fwd(x[0], y[0], wx, bx, wy, by))
    ref1 = ref(x[0], y[0], wx, bx, wy, by)
    assert out1.shape == (B, x_dim)
    assert jnp.allclose(out1, ref1, atol=1e-3, rtol=1e-3), \
        float(jnp.max(jnp.abs(out1 - ref1)))

    # 2) E episodes batched: E_TILE episodes fused per grid step, megacore-parallel.
    out = jax.block_until_ready(fwd(x, y, wx, bx, wy, by))
    assert out.shape == (E, B, x_dim)
    for i in range(E):
        refi = ref(x[i], y[i], wx, bx, wy, by)
        assert jnp.allclose(out[i], refi, atol=1e-3, rtol=1e-3), \
            float(jnp.max(jnp.abs(out[i] - refi)))

    # 3) bf16 storage / MXU path (f32 accumulation + f32 softmax in-kernel).
    bf = jnp.bfloat16
    out_bf = jax.block_until_ready(
        fwd(x.astype(bf), y.astype(bf), wx.astype(bf), bx.astype(bf),
            wy.astype(bf), by.astype(bf)))
    assert out_bf.dtype == bf and out_bf.shape == (E, B, x_dim)
    f32 = jnp.float32
    for i in range(E):
        refi = ref(x[i].astype(bf).astype(f32), y[i].astype(bf).astype(f32),
                   wx.astype(bf).astype(f32), bx.astype(bf).astype(f32),
                   wy.astype(bf).astype(f32), by.astype(bf).astype(f32))
        assert jnp.allclose(out_bf[i].astype(f32), refi, atol=3e-2, rtol=3e-2), \
            float(jnp.max(jnp.abs(out_bf[i].astype(f32) - refi)))

    print("KERNEL_OK")
</pallas_src>

<mosaic_0001>
module attributes {stable_mosaic.version = 11 : i64} {
  func.func @mfb_kernel(%arg0: i32, %arg1: memref<8x72xf32, #tpu.memory_space<vmem>>, %arg2: memref<72x32xf32, #tpu.memory_space<vmem>>, %arg3: memref<8x2xf32, #tpu.memory_space<vmem>>, %arg4: memref<8x32xf32, #tpu.memory_space<vmem>>) attributes {dimension_semantics = [#tpu.dimension_semantics<parallel>], iteration_bounds = array<i64: 1>, scalar_prefetch = 0 : i64, scratch_operands = 0 : i64, tpu.core_type = #tpu.core_type<tc>, window_params = [{transform_indices = @transform_0, window_bounds = array<i64: 8, 72>}, {pipeline_mode = #tpu.pipeline_mode<synchronous>, transform_indices = @transform_1, window_bounds = array<i64: 72, 32>}, {pipeline_mode = #tpu.pipeline_mode<synchronous>, transform_indices = @transform_2, window_bounds = array<i64: 8, 2>}, {transform_indices = @transform_3, window_bounds = array<i64: 8, 32>}]} {
    %c0 = arith.constant 0 : index
    %c0_0 = arith.constant 0 : index
    %0 = vector.load %arg1[%c0, %c0_0] : memref<8x72xf32, #tpu.memory_space<vmem>>, vector<8x72xf32>
    %c0_1 = arith.constant 0 : index
    %c0_2 = arith.constant 0 : index
    %1 = vector.load %arg2[%c0_1, %c0_2] : memref<72x32xf32, #tpu.memory_space<vmem>>, vector<72x32xf32>
    %cst = arith.constant dense<0.000000e+00> : vector<8x32xf32>
    %2 = tpu.matmul %0, %1, %cst {dimension_numbers = #tpu.dot_dimension_numbers<[1], [0], [0], [1], [0, 0, 1, 1], [], []>} : vector<8x72xf32>, vector<72x32xf32>, vector<8x32xf32> -> vector<8x32xf32>
    %3 = vector.extract_strided_slice %2 {offsets = [0, 0], sizes = [8, 16], strides = [1, 1]} : vector<8x32xf32> to vector<8x16xf32>
    %4 = vector.extract_strided_slice %2 {offsets = [0, 16], sizes = [8, 16], strides = [1, 1]} : vector<8x32xf32> to vector<8x16xf32>
    %5 = arith.mulf %3, %4 : vector<8x16xf32>
    %cst_3 = arith.constant dense<0.000000e+00> : vector<8xf32>
    %6 = vector.multi_reduction <add>, %5, %cst_3 [1] : vector<8x16xf32> to vector<8xf32>
    %7 = vector.shape_cast %6 : vector<8xf32> to vector<8x1xf32>
    %c0_4 = arith.constant 0 : index
    %c0_5 = arith.constant 0 : index
    %8 = vector.load %arg3[%c0_4, %c0_5] : memref<8x2xf32, #tpu.memory_space<vmem>>, vector<8x2xf32>
    %cst_6 = arith.constant 0.000000e+00 : f32
    %9 = vector.broadcast %cst_6 : f32 to vector<8x2xf32>
    %10 = arith.cmpf ogt, %8, %9 : vector<8x2xf32>
    %cst_7 = arith.constant -1.000000e+30 : f32
    %11 = vector.shape_cast %7 : vector<8x1xf32> to vector<8x1xf32>
    %12 = vector.broadcast %11 : vector<8x1xf32> to vector<8x2xf32>
    %13 = vector.broadcast %cst_7 : f32 to vector<8x2xf32>
    %14 = arith.select %10, %12, %13 : vector<8x2xi1>, vector<8x2xf32>
    %cst_8 = arith.constant dense<0xFF800000> : vector<2xf32>
    %15 = vector.multi_reduction <maximumf>, %14, %cst_8 [0] : vector<8x2xf32> to vector<2xf32>
    %16 = vector.shape_cast %15 : vector<2xf32> to vector<1x2xf32>
    %17 = vector.broadcast %16 : vector<1x2xf32> to vector<8x2xf32>
    %18 = arith.mulf %8, %17 : vector<8x2xf32>
    %cst_9 = arith.constant dense<0.000000e+00> : vector<8xf32>
    %19 = vector.multi_reduction <add>, %18, %cst_9 [1] : vector<8x2xf32> to vector<8xf32>
    %20 = vector.shape_cast %19 : vector<8xf32> to vector<8x1xf32>
    %21 = arith.subf %7, %20 : vector<8x1xf32>
    %22 = math.exp %21 : vector<8x1xf32>
    %23 = vector.broadcast %22 : vector<8x1xf32> to vector<8x2xf32>
    %24 = arith.mulf %8, %23 : vector<8x2xf32>
    %cst_10 = arith.constant dense<0.000000e+00> : vector<2xf32>
    %25 = vector.multi_reduction <add>, %24, %cst_10 [0] : vector<8x2xf32> to vector<2xf32>
    %26 = vector.shape_cast %25 : vector<2xf32> to vector<1x2xf32>
    %27 = vector.broadcast %26 : vector<1x2xf32> to vector<8x2xf32>
    %28 = arith.mulf %8, %27 : vector<8x2xf32>
    %cst_11 = arith.constant dense<0.000000e+00> : vector<8xf32>
    %29 = vector.multi_reduction <add>, %28, %cst_11 [1] : vector<8x2xf32> to vector<8xf32>
    %30 = vector.shape_cast %29 : vector<8xf32> to vector<8x1xf32>
    %31 = arith.divf %22, %30 : vector<8x1xf32>
    %32 = vector.extract_strided_slice %0 {offsets = [0, 0], sizes = [8, 32], strides = [1, 1]} : vector<8x72xf32> to vector<8x32xf32>
    %33 = vector.broadcast %31 : vector<8x1xf32> to vector<8x32xf32>
    %34 = arith.mulf %33, %32 : vector<8x32xf32>
    %c0_12 = arith.constant 0 : index
    %c0_13 = arith.constant 0 : index
    %35 = vector.load %arg4[%c0_12, %c0_13] : memref<8x32xf32, #tpu.memory_space<vmem>>, vector<8x32xf32>
    tpu.vector_store %arg4[%c0_12, %c0_13], %34 {strides = array<i32>} : memref<8x32xf32, #tpu.memory_space<vmem>>, vector<8x32xf32>,
    return
  }
  func.func @transform_0(%arg0: i32) -> (i32, i32) {
    %c0_i32 = arith.constant 0 : i32
    %c0_i32_0 = arith.constant 0 : i32
    return %arg0, %c0_i32 : i32, i32
  }
  func.func @transform_1(%arg0: i32) -> (i32, i32) {
    %c0_i32 = arith.constant 0 : i32
    %c0_i32_0 = arith.constant 0 : i32
    %c0_i32_1 = arith.constant 0 : i32
    return %c0_i32, %c0_i32_0 : i32, i32
  }
  func.func @transform_2(%arg0: i32) -> (i32, i32) {
    %c0_i32 = arith.constant 0 : i32
    %c0_i32_0 = arith.constant 0 : i32
    %c0_i32_1 = arith.constant 0 : i32
    return %c0_i32, %c0_i32_0 : i32, i32
  }
  func.func @transform_3(%arg0: i32) -> (i32, i32) {
    %c0_i32 = arith.constant 0 : i32
    %c0_i32_0 = arith.constant 0 : i32
    return %arg0, %c0_i32 : i32, i32
  }
}

</mosaic_0001>

<bundles_post_ra>
// kernel: mfb_forward.1
= control target key start
LH: loop header
LB: loop body
LE: loop exit
PB: predicated region body
PF: predicated region fallthrough
CT: control target
= control target key end

     0   :  { %v219_v1 = vmov 0.0   ;;  %vm220_vm0 = vmmov 0   ;;  %s283_s0 = inlined_call_operand.vmem [shape: f32[8,72], index: 0, kind: input, shape index: {}]   ;;  %s284_s1 = inlined_call_operand.vmem [shape: f32[72,32], index: 1, kind: input, shape index: {}]   ;;  %s285_s2 = inlined_call_operand.vmem [shape: f32[8,2], index: 2, kind: input, shape index: {}]   ;;  %s286_s3 = inlined_call_operand.hbm [shape: f32[8,32], index: 3, kind: output, shape index: {}]  }
   0x1   :  { %v24_v0 = vld [vmem:[%s284_s1 + $0x40] sm:$0xff]  ;;  %168 = vmatprep.subr.mxu0 %v219_v1  ;;  %v23_v2 = vld [vmem:[%s284_s1 + $0x38] sm:$0xff]  ;;  %186 = vmatprep.mubr.msk.f32.mxu0 %vm220_vm0, %v219_v1  ;;  %v22_v3 = vld [vmem:[%s284_s1 + $0x30] sm:$0xff] }
   0x2   :  { %169 = vmatpush3.msra.mxu0 %v24_v0 }
   0x3   :  { %170 = vmatprep.subr.mxu0 %v219_v1 }
   0x4   :  { %8 = vsyncpa [#allocation3], 0  ;;  %171 = vmatpush3.msra.mxu0 %v23_v2  ;;  %v21_v4 = vld [vmem:[%s284_s1 + $0x28] sm:$0xff]  ;;  %v20_v5 = vld [vmem:[%s284_s1 + $0x20] sm:$0xff]  ;;  %vm25_vm1 = vcmask 588800   ;;  %s221_s5 = smov 112  }
   0x5   :  { %172 = vmatprep.subr.mxu0 %v219_v1  ;;  %v19_v6 = vld [vmem:[%s284_s1 + $0x18] sm:$0xff]  ;;  %v18_v7 = vld [vmem:[%s284_s1 + $0x10] sm:$0xff]  ;;  %v17_v8 = vld [vmem:[%s284_s1 + $0x8] sm:$0xff]  ;;  %vm104_vm2 = vcmask 130048   ;;  %vm111_vm4 = vcmask 15360   ;;  %vm141_vm5 = vcmask 261120  }
   0x6   :  { %173 = vmatpush3.msra.mxu0 %v22_v3  ;;  %v16_v9 = vld [vmem:[%s284_s1] sm:$0xff] }
   0x7   :  { %174 = vmatprep.subr.mxu0 %v219_v1  ;;  %v15_v10 = vld [vmem:[%s283_s0] sm:$0xff]  ;;  %s222_s0 = smov [#allocation2]  }
   0x8   :  { %175 = vmatpush3.msra.mxu0 %v21_v4  ;;  %v108_v16 = vld [vmem:[%s285_s2] sm:$0xff]  ;;  %s149_s2 = sshll.u32 %s222_s0, 4  ;;  %s150_s2 = int_to_ptr.vmem [resolvable:$true] %s149_s2 }
   0x9   :  { %176 = vmatprep.subr.mxu0 %v219_v1  ;;  %vm109_vm3 = vcmp.gt.f32.partialorder %v108_v16, 0.0  ;;  %s197_s7 = scalar_lea.vmem %s150_s2, 128  ;;  %p202_p1 = scmp.lt.s32.totalorder %s150_s2, %s150_s2 }
   0xa   :  { %177 = vmatpush3.msra.mxu0 %v20_v5  ;;  %p198_p0 = scmp.ne.s32.totalorder %s150_s2, %s197_s7  ;;  %p203_p2 = scmp.lt.s32.totalorder %s197_s7, %s197_s7 }
   0xb   :  { %178 = vmatprep.subr.mxu0 %v219_v1 }
   0xc   :  { %179 = vmatpush3.msra.mxu0 %v19_v6  ;;  %p204_p3 = por %p203_p2, %p202_p1 }
   0xd   :  { %180 = vmatprep.subr.mxu0 %v219_v1 }
   0xe   :  { %181 = vmatpush3.msra.mxu0 %v18_v7  ;;  %p205_p4 = pnand %p204_p3, %p198_p0 }
   0xf   :  { %182 = vmatprep.subr.mxu0 %v219_v1 }
  0x10   :  { %183 = vmatpush3.msra.mxu0 %v17_v8 }
  0x11   :  { %184 = vmatprep.subr.mxu0 %v219_v1 }
  0x12   :  { %185 = vmatpush3.msra.mxu0 %v16_v9 }
  0x13   :  { %187 = vmatmul.mubr.msk.f32.vlgmr.msra.gmra.mxu0 %vm25_vm1, %v15_v10 }
  0xd3   :  { %v95_v11 = vpop.f32.mrf.mxu0 }
  0xd4   :  { %100 = vrot.lane.b32.xlu0 %v95_v11, %s221_s5 }
  0xd5   :  { %v188_v12 = vpop.f32.mrf.mxu0 }
 0x146   :  { %v101_v13 = vpop.permute.xlu0 %100 }
 0x147   :  { %v103_v14 = vmul.f32 %v101_v13, %v95_v11 }
 0x149   :  { %v105_v15 = vsel %vm104_vm2, %v103_v14, 0.0 }
 0x14a   :  { %106 = vadd.xlane.f32.xlu0 %v105_v15 }
 0x1d3   :  { %v107_v17 = vpop.xlane.xlu0 %106 }
 0x1d4   :  { %v110_v18 = vsel %vm109_vm3, %v107_v17, -1e+30 }
 0x1d5   :  { %v112_v19 = vsel %vm111_vm4, %v110_v18, -inf }
 0x1d6   :  { %v113_v20 = vrot.slane %v112_v19, 4 }
 0x1d8   :  { %v114_v21 = vmax.f32 %v112_v19, %v113_v20 }
 0x1da   :  { %v115_v22 = vrot.slane %v114_v21, 2 }
 0x1dc   :  { %v116_v23 = vmax.f32 %v114_v21, %v115_v22 }
 0x1de   :  { %v117_v24 = vrot.slane %v116_v23, 1 }
 0x1e0   :  { %v118_v25 = vmax.f32 %v116_v23, %v117_v24 }
 0x1e2   :  { %v119_v26 = vmul.f32 %v118_v25, %v108_v16 }
 0x1e4   :  { %v120_v27 = vsel %vm111_vm4, %v119_v26, 0.0 }
 0x1e5   :  { %121 = vadd.xlane.f32.xlu1 %v120_v27 }
 0x26e   :  { %v122_v28 = vpop.xlane.xlu1 %121 }
 0x26f   :  { %v123_v29 = vsub.f32 %v107_v17, %v122_v28 }
 0x271   :  { %v124_v30 = vmul.f32 1.442695, %v123_v29 }
 0x273   :  { %193 = vpow2.f32 %v124_v30 }
 0x280   :  { %v194_v31 = vpop.eup %193 }
 0x281   :  { %v126_v32 = vmul.f32 %v194_v31, %v108_v16 }
 0x283   :  { %v127_v33 = vsel %vm111_vm4, %v126_v32, 0.0 }
 0x284   :  { %v128_v34 = vrot.slane %v127_v33, 4 }
 0x286   :  { %v129_v35 = vadd.f32 %v128_v34, %v127_v33 }
 0x288   :  { %v130_v36 = vrot.slane %v129_v35, 2 }
 0x28a   :  { %v131_v37 = vadd.f32 %v130_v36, %v129_v35 }
 0x28c   :  { %v132_v38 = vrot.slane %v131_v37, 1 }
 0x28e   :  { %v133_v39 = vadd.f32 %v132_v38, %v131_v37 }
 0x290   :  { %v134_v40 = vmul.f32 %v133_v39, %v108_v16 }
 0x292   :  { %v135_v41 = vsel %vm111_vm4, %v134_v40, 0.0 }
 0x293   :  { %136 = vadd.xlane.f32.xlu1 %v135_v41 }
 0x31c   :  { %v137_v42 = vpop.xlane.xlu1 %136 }
 0x31d   :  { %195 = vrcp.f32 %v137_v42 }
 0x32a   :  { %v196_v43 = vpop.eup %195 }
 0x32b   :  { %v139_v44 = vmul.f32 %v196_v43, %v194_v31 }
 0x32d   :  { %v140_v45 = vmul.f32 %v139_v44, %v15_v10 }
 0x32f   :  { %142 = vst.msk [vmem:[#allocation2] sm:$0xff] %vm141_vm5, %v140_v45 }
 0x330   :  { %208 = shalt.err (!%p205_p4)
}
 0x331   :  { %152 = dma.vmem_to_hbm [thread:$0]  %s150_s2, 128, %s286_s3, [#allocation3]  }
 0x332   :  { %217 = dma.done.wait [#allocation3], 128  }
 0x333   :  { %218 = vsyncadd [#allocation3], 4294967168 }
 0x334   :  { %156 = vsyncpa [#allocation3], 1 }

</bundles_post_ra>
